<compile_context>
chip_gen: v7x
topology: tpu7x:2x2x1
jax: 0.10.0
libtpu: 0.0.40
codegen_flags: <defaults>
</compile_context>

<pallas_src>
import jax
import jax.numpy as jnp
from jax import lax
from jax.experimental import pallas as pl
from jax.experimental.pallas import tpu as pltpu


# ----------------------------- Pallas kernel --------------------------------
def image_encoder_kernel(patches_ref, w_patch_ref, w_pool_ref, w_proj_ref,
                         bias_ref, out_ref):
    """Fused: mean pool -> patch-embed matmul -> tanh pooler -> projector -> L2 norm."""
    Hp = w_pool_ref.shape[0]          # padded hidden size (multiple of 128)
    Cp = w_proj_ref.shape[1]          # padded code size   (multiple of 128)
    mm_dtype = w_patch_ref.dtype      # bf16 (or f32) matmul operand dtype

    # Consolidated, lane-padded biases (kept in f32; elementwise stays f32).
    b_patch = bias_ref[:, 0:Hp]                       # (1, Hp)
    b_pool = bias_ref[:, Hp:2 * Hp]                   # (1, Hp)
    b_proj = bias_ref[:, 2 * Hp:2 * Hp + Cp]          # (1, Cp)

    # Mean over patches BEFORE the patch-embed matmul (pool commutes with the
    # linear map) -> single (TB, Dp) x (Dp, Hp) matmul instead of (TB, P, Hp).
    pooled = jnp.mean(patches_ref[...].astype(jnp.float32), axis=1)   # (TB, Dp)

    # Patch embedding (== Conv2d(kernel=stride=patch) on flattened patches).
    emb = jnp.dot(pooled.astype(mm_dtype), w_patch_ref[...],
                  preferred_element_type=jnp.float32) + b_patch       # (TB, Hp)

    # ViT/BERT-style pooler: dense + tanh -> pooler_output.
    pooler = jnp.tanh(
        jnp.dot(emb.astype(mm_dtype), w_pool_ref[...],
                preferred_element_type=jnp.float32) + b_pool)         # (TB, Hp)

    # code_projector: Linear(hidden_size, code_size). Padded lanes stay 0.
    codes = jnp.dot(pooler.astype(mm_dtype), w_proj_ref[...],
                    preferred_element_type=jnp.float32) + b_proj      # (TB, Cp)

    # F.normalize: x / max(||x||_2, 1e-12)  ==  x * rsqrt(max(sum(x^2), 1e-24)).
    sumsq = jnp.sum(codes * codes, axis=-1, keepdims=True)
    inv = lax.rsqrt(jnp.maximum(sumsq, 1e-24))
    out_ref[...] = (codes * inv).astype(out_ref.dtype)


# ------------------------------ helpers --------------------------------------
def _round_up(x, m):
    return (x + m - 1) // m * m


def extract_patches_nchw(x, patch):
    """(B, C, H, W) -> (B, num_patches, C*patch*patch), channel-major per patch."""
    B, C, H, W = x.shape
    gh, gw = H // patch, W // patch
    x = x.reshape(B, C, gh, patch, gw, patch)
    x = jnp.transpose(x, (0, 2, 4, 1, 3, 5))           # (B, gh, gw, C, ph, pw)
    return x.reshape(B, gh * gw, C * patch * patch)


# ------------------------------ JAX wrapper ----------------------------------
def image_encoder_forward(image_features, params, *, patch,
                          compute_dtype=jnp.bfloat16, batch_tile=None):
    """image_features: (B, C, H, W) float32 (NCHW, like PyTorch)."""
    B = image_features.shape[0]
    d_patch, hidden = params["w_patch"].shape
    code_size = params["w_proj"].shape[1]

    # Lane/sublane-dense padded sizes.
    Dp = _round_up(d_patch, 128)
    Hp = _round_up(hidden, 128)
    Cp = _round_up(code_size, 128)

    patches = extract_patches_nchw(image_features.astype(jnp.float32), patch)
    P = patches.shape[1]

    bytes_per = jnp.dtype(compute_dtype).itemsize
    weight_bytes = (Dp * Hp + Hp * Hp + Hp * Cp) * bytes_per + (2 * Hp + Cp) * 4
    # per batch-row VMEM: double-buffered patch block + f32 temp for the pool
    # reduce + double-buffered f32 output row.
    per_row = P * Dp * (2 * bytes_per + 4) + Cp * 4 * 2
    vmem_budget = 24 * 1024 * 1024          # v7x-safe (64 MiB phys / 32 MiB scoped)

    if batch_tile is None:
        tb = max(8, (vmem_budget - 2 * weight_bytes) // per_row)
        tb = min(tb, 256, _round_up(B, 8))
        tb = max(8, (tb // 8) * 8)
    else:
        tb = batch_tile
    Bp = _round_up(B, tb)
    grid = (Bp // tb,)

    # Zero-pad batch / feature / hidden / code dims (exactness preserved,
    # padded code lanes are exactly 0 so the L2 norm is unchanged).
    patches = jnp.pad(patches, ((0, Bp - B), (0, 0), (0, Dp - d_patch)))
    patches = patches.astype(compute_dtype)

    w_patch = jnp.pad(params["w_patch"],
                      ((0, Dp - d_patch), (0, Hp - hidden))).astype(compute_dtype)
    w_pool = jnp.pad(params["w_pool"],
                     ((0, Hp - hidden), (0, Hp - hidden))).astype(compute_dtype)
    w_proj = jnp.pad(params["w_proj"],
                     ((0, Hp - hidden), (0, Cp - code_size))).astype(compute_dtype)

    # Consolidate all three biases into one lane-padded f32 block (single DMA).
    biases = jnp.concatenate([
        jnp.pad(params["b_patch"], ((0, 0), (0, Hp - hidden))),
        jnp.pad(params["b_pool"], ((0, 0), (0, Hp - hidden))),
        jnp.pad(params["b_proj"], ((0, 0), (0, Cp - code_size))),
    ], axis=1).astype(jnp.float32)                      # (1, 2*Hp + Cp)

    vmem_limit = int(min(64 * 1024 * 1024,
                         max(8 * 1024 * 1024,
                             2 * weight_bytes + tb * per_row + 4 * 1024 * 1024)))

    cost = pl.CostEstimate(
        flops=int(Bp * P * Dp                      # mean pool
                  + 2 * Bp * Dp * Hp               # patch embed
                  + 2 * Bp * Hp * Hp               # pooler dense
                  + 2 * Bp * Hp * Cp),             # code projector
        transcendentals=int(Bp * Hp + Bp),         # tanh + rsqrt
        bytes_accessed=int(Bp * P * Dp * bytes_per + weight_bytes + Bp * Cp * 4),
    )

    out = pl.pallas_call(
        image_encoder_kernel,
        out_shape=jax.ShapeDtypeStruct((Bp, Cp), jnp.float32),
        grid_spec=pltpu.PrefetchScalarGridSpec(
            num_scalar_prefetch=0,
            grid=grid,
            in_specs=[
                pl.BlockSpec((tb, P, Dp), lambda b: (b, 0, 0)),     # patches (tiled)
                pl.BlockSpec((Dp, Hp), lambda b: (0, 0)),           # w_patch (resident)
                pl.BlockSpec((Hp, Hp), lambda b: (0, 0)),           # w_pool  (resident)
                pl.BlockSpec((Hp, Cp), lambda b: (0, 0)),           # w_proj  (resident)
                pl.BlockSpec((1, 2 * Hp + Cp), lambda b: (0, 0)),   # biases  (resident)
            ],
            out_specs=pl.BlockSpec((tb, Cp), lambda b: (b, 0)),
        ),
        compiler_params=pltpu.CompilerParams(
            dimension_semantics=("parallel",),
            vmem_limit_bytes=vmem_limit,
        ),
        cost_estimate=cost,
    )(patches, w_patch, w_pool, w_proj, biases)

    return out[:B, :code_size]


def init_params(key, *, in_chans, patch, hidden, code_size):
    d_patch = in_chans * patch * patch
    ks = jax.random.split(key, 6)
    scale_p = 1.0 / jnp.sqrt(d_patch)
    scale_h = 1.0 / jnp.sqrt(hidden)
    return {
        # patch embedding (Conv2d weight flattened to (C*ph*pw, hidden))
        "w_patch": jax.random.uniform(ks[0], (d_patch, hidden), jnp.float32,
                                      -scale_p, scale_p),
        "b_patch": jax.random.uniform(ks[1], (1, hidden), jnp.float32,
                                      -scale_p, scale_p),
        # pooler dense (hidden -> hidden)
        "w_pool": jax.random.uniform(ks[2], (hidden, hidden), jnp.float32,
                                     -scale_h, scale_h),
        "b_pool": jax.random.uniform(ks[3], (1, hidden), jnp.float32,
                                     -scale_h, scale_h),
        # code_projector = nn.Linear(hidden_size, code_size)
        "w_proj": jax.random.uniform(ks[4], (hidden, code_size), jnp.float32,
                                     -scale_h, scale_h),
        "b_proj": jax.random.uniform(ks[5], (1, code_size), jnp.float32,
                                     -scale_h, scale_h),
    }


# ------------------------- pure-JAX reference --------------------------------
def reference_forward(image_features, params, *, patch):
    """Original (un-hoisted) math order, full f32."""
    patches = extract_patches_nchw(image_features.astype(jnp.float32), patch)
    emb = jnp.einsum("bpd,dh->bph", patches, params["w_patch"]) + params["b_patch"]
    pooled = jnp.mean(emb, axis=1)
    pooler = jnp.tanh(pooled @ params["w_pool"] + params["b_pool"])
    codes = pooler @ params["w_proj"] + params["b_proj"]
    norm = jnp.maximum(jnp.linalg.norm(codes, axis=-1, keepdims=True), 1e-12)
    return codes / norm


if __name__ == "__main__":
    B, C, H, W = 2, 4, 16, 16       # small NCHW image batch
    PATCH = 4                       # 16 patches of 4x4
    HIDDEN = 32                     # backbone_encoder.config.hidden_size
    CODE = 16                       # code_size

    key = jax.random.PRNGKey(0)
    k_img, k_par = jax.random.split(key)
    image_features = jax.random.normal(k_img, (B, C, H, W), jnp.float32)
    params = init_params(k_par, in_chans=C, patch=PATCH,
                         hidden=HIDDEN, code_size=CODE)

    ref = reference_forward(image_features, params, patch=PATCH)

    # Fast path: bf16 matmul operands, f32 accumulation.
    out_bf16 = jax.block_until_ready(
        image_encoder_forward(image_features, params, patch=PATCH,
                              compute_dtype=jnp.bfloat16))
    assert out_bf16.shape == (B, CODE)
    # unit-norm check (F.normalize semantics; normalization done in f32)
    assert jnp.allclose(jnp.linalg.norm(out_bf16, axis=-1), 1.0, atol=1e-4)
    assert jnp.allclose(out_bf16, ref, atol=3e-2, rtol=3e-2), \
        "bf16 kernel mismatch vs f32 reference"

    # Exactness of the fused structure (pool-before-matmul, padding, rsqrt norm)
    # checked with f32 operands against the un-hoisted f32 reference.
    out_f32 = jax.block_until_ready(
        image_encoder_forward(image_features, params, patch=PATCH,
                              compute_dtype=jnp.float32))
    assert out_f32.shape == (B, CODE)
    assert jnp.allclose(out_f32, ref, atol=1e-4, rtol=1e-4), \
        "f32 kernel mismatch vs reference"

    print("KERNEL_OK")
</pallas_src>

<mosaic_0001>
module attributes {stable_mosaic.version = 11 : i64} {
  func.func @image_encoder_kernel(%arg0: i32, %arg1: memref<8x16x128xbf16, #tpu.memory_space<vmem>>, %arg2: memref<128x128xbf16, #tpu.memory_space<vmem>>, %arg3: memref<128x128xbf16, #tpu.memory_space<vmem>>, %arg4: memref<128x128xbf16, #tpu.memory_space<vmem>>, %arg5: memref<1x384xf32, #tpu.memory_space<vmem>>, %arg6: memref<8x128xf32, #tpu.memory_space<vmem>>) attributes {dimension_semantics = [#tpu.dimension_semantics<parallel>], iteration_bounds = array<i64: 1>, scalar_prefetch = 0 : i64, scratch_operands = 0 : i64, tpu.core_type = #tpu.core_type<tc>, window_params = [{transform_indices = @transform_0, window_bounds = array<i64: 8, 16, 128>}, {pipeline_mode = #tpu.pipeline_mode<synchronous>, transform_indices = @transform_1, window_bounds = array<i64: 128, 128>}, {pipeline_mode = #tpu.pipeline_mode<synchronous>, transform_indices = @transform_2, window_bounds = array<i64: 128, 128>}, {pipeline_mode = #tpu.pipeline_mode<synchronous>, transform_indices = @transform_3, window_bounds = array<i64: 128, 128>}, {pipeline_mode = #tpu.pipeline_mode<synchronous>, transform_indices = @transform_4, window_bounds = array<i64: 1, 384>}, {transform_indices = @transform_5, window_bounds = array<i64: 8, 128>}]} {
    %c0 = arith.constant 0 : index
    %c0_0 = arith.constant 0 : index
    %0 = vector.load %arg5[%c0, %c0_0] : memref<1x384xf32, #tpu.memory_space<vmem>>, vector<1x128xf32>
    %c0_1 = arith.constant 0 : index
    %c128 = arith.constant 128 : index
    %1 = vector.load %arg5[%c0_1, %c128] : memref<1x384xf32, #tpu.memory_space<vmem>>, vector<1x128xf32>
    %c0_2 = arith.constant 0 : index
    %c256 = arith.constant 256 : index
    %2 = vector.load %arg5[%c0_2, %c256] : memref<1x384xf32, #tpu.memory_space<vmem>>, vector<1x128xf32>
    %c0_3 = arith.constant 0 : index
    %c0_4 = arith.constant 0 : index
    %c0_5 = arith.constant 0 : index
    %3 = vector.load %arg1[%c0_3, %c0_4, %c0_5] : memref<8x16x128xbf16, #tpu.memory_space<vmem>>, vector<8x16x128xbf16>
    %4 = arith.extf %3 : vector<8x16x128xbf16> to vector<8x16x128xf32>
    %cst = arith.constant dense<0.000000e+00> : vector<8x128xf32>
    %5 = vector.multi_reduction <add>, %4, %cst [1] : vector<8x16x128xf32> to vector<8x128xf32>
    %cst_6 = arith.constant 1.600000e+01 : f32
    %6 = vector.broadcast %cst_6 : f32 to vector<8x128xf32>
    %7 = arith.divf %5, %6 : vector<8x128xf32>
    %8 = arith.truncf %7 : vector<8x128xf32> to vector<8x128xbf16>
    %c0_7 = arith.constant 0 : index
    %c0_8 = arith.constant 0 : index
    %9 = vector.load %arg2[%c0_7, %c0_8] : memref<128x128xbf16, #tpu.memory_space<vmem>>, vector<128x128xbf16>
    %cst_9 = arith.constant dense<0.000000e+00> : vector<8x128xf32>
    %10 = tpu.matmul %8, %9, %cst_9 {dimension_numbers = #tpu.dot_dimension_numbers<[1], [0], [0], [1], [0, 0, 1, 1], [], []>} : vector<8x128xbf16>, vector<128x128xbf16>, vector<8x128xf32> -> vector<8x128xf32>
    %11 = vector.broadcast %0 : vector<1x128xf32> to vector<8x128xf32>
    %12 = arith.addf %10, %11 : vector<8x128xf32>
    %13 = arith.truncf %12 : vector<8x128xf32> to vector<8x128xbf16>
    %c0_10 = arith.constant 0 : index
    %c0_11 = arith.constant 0 : index
    %14 = vector.load %arg3[%c0_10, %c0_11] : memref<128x128xbf16, #tpu.memory_space<vmem>>, vector<128x128xbf16>
    %cst_12 = arith.constant dense<0.000000e+00> : vector<8x128xf32>
    %15 = tpu.matmul %13, %14, %cst_12 {dimension_numbers = #tpu.dot_dimension_numbers<[1], [0], [0], [1], [0, 0, 1, 1], [], []>} : vector<8x128xbf16>, vector<128x128xbf16>, vector<8x128xf32> -> vector<8x128xf32>
    %16 = vector.broadcast %1 : vector<1x128xf32> to vector<8x128xf32>
    %17 = arith.addf %15, %16 : vector<8x128xf32>
    %18 = math.tanh %17 : vector<8x128xf32>
    %19 = arith.truncf %18 : vector<8x128xf32> to vector<8x128xbf16>
    %c0_13 = arith.constant 0 : index
    %c0_14 = arith.constant 0 : index
    %20 = vector.load %arg4[%c0_13, %c0_14] : memref<128x128xbf16, #tpu.memory_space<vmem>>, vector<128x128xbf16>
    %cst_15 = arith.constant dense<0.000000e+00> : vector<8x128xf32>
    %21 = tpu.matmul %19, %20, %cst_15 {dimension_numbers = #tpu.dot_dimension_numbers<[1], [0], [0], [1], [0, 0, 1, 1], [], []>} : vector<8x128xbf16>, vector<128x128xbf16>, vector<8x128xf32> -> vector<8x128xf32>
    %22 = vector.broadcast %2 : vector<1x128xf32> to vector<8x128xf32>
    %23 = arith.addf %21, %22 : vector<8x128xf32>
    %24 = arith.mulf %23, %23 : vector<8x128xf32>
    %cst_16 = arith.constant dense<0.000000e+00> : vector<8xf32>
    %25 = vector.multi_reduction <add>, %24, %cst_16 [1] : vector<8x128xf32> to vector<8xf32>
    %26 = vector.shape_cast %25 : vector<8xf32> to vector<8x1xf32>
    %cst_17 = arith.constant 1.000000e-24 : f32
    %27 = vector.broadcast %cst_17 : f32 to vector<8x1xf32>
    %28 = arith.maximumf %26, %27 : vector<8x1xf32>
    %29 = math.rsqrt %28 : vector<8x1xf32>
    %30 = vector.broadcast %29 : vector<8x1xf32> to vector<8x128xf32>
    %31 = arith.mulf %23, %30 : vector<8x128xf32>
    %c0_18 = arith.constant 0 : index
    %c0_19 = arith.constant 0 : index
    %32 = vector.load %arg6[%c0_18, %c0_19] : memref<8x128xf32, #tpu.memory_space<vmem>>, vector<8x128xf32>
    tpu.vector_store %arg6[%c0_18, %c0_19], %31 {strides = array<i32>} : memref<8x128xf32, #tpu.memory_space<vmem>>, vector<8x128xf32>,
    return
  }
  func.func @transform_0(%arg0: i32) -> (i32, i32, i32) {
    %c0_i32 = arith.constant 0 : i32
    %c0_i32_0 = arith.constant 0 : i32
    %c0_i32_1 = arith.constant 0 : i32
    return %arg0, %c0_i32, %c0_i32_0 : i32, i32, i32
  }
  func.func @transform_1(%arg0: i32) -> (i32, i32) {
    %c0_i32 = arith.constant 0 : i32
    %c0_i32_0 = arith.constant 0 : i32
    %c0_i32_1 = arith.constant 0 : i32
    return %c0_i32, %c0_i32_0 : i32, i32
  }
  func.func @transform_2(%arg0: i32) -> (i32, i32) {
    %c0_i32 = arith.constant 0 : i32
    %c0_i32_0 = arith.constant 0 : i32
    %c0_i32_1 = arith.constant 0 : i32
    return %c0_i32, %c0_i32_0 : i32, i32
  }
  func.func @transform_3(%arg0: i32) -> (i32, i32) {
    %c0_i32 = arith.constant 0 : i32
    %c0_i32_0 = arith.constant 0 : i32
    %c0_i32_1 = arith.constant 0 : i32
    return %c0_i32, %c0_i32_0 : i32, i32
  }
  func.func @transform_4(%arg0: i32) -> (i32, i32) {
    %c0_i32 = arith.constant 0 : i32
    %c0_i32_0 = arith.constant 0 : i32
    %c0_i32_1 = arith.constant 0 : i32
    return %c0_i32, %c0_i32_0 : i32, i32
  }
  func.func @transform_5(%arg0: i32) -> (i32, i32) {
    %c0_i32 = arith.constant 0 : i32
    %c0_i32_0 = arith.constant 0 : i32
    return %arg0, %c0_i32 : i32, i32
  }
}

</mosaic_0001>

<bundles_post_ra>
// kernel: tpu_custom_call.1
= control target key start
LH: loop header
LB: loop body
LE: loop exit
PB: predicated region body
PF: predicated region fallthrough
CT: control target
= control target key end

     0   :  { %10 = vsyncpa [#allocation3], 0  ;;  %s1048_s0 = inlined_call_operand.hbm [shape: bf16[8,16,128], index: 0, kind: input, shape index: {}]   ;;  %s1049_s1 = inlined_call_operand.hbm [shape: bf16[128,128], index: 1, kind: input, shape index: {}]   ;;  %s1050_s2 = inlined_call_operand.hbm [shape: bf16[128,128], index: 2, kind: input, shape index: {}]   ;;  %s1051_s3 = inlined_call_operand.hbm [shape: bf16[128,128], index: 3, kind: input, shape index: {}]   ;;  %s1052_s4 = inlined_call_operand.vmem [shape: f32[1,384], index: 4, kind: input, shape index: {}]   ;;  %s1053_s5 = inlined_call_operand.hbm [shape: f32[8,128], index: 5, kind: output, shape index: {}]  }
   0x1   :  { %11 = vsyncpa [#allocation6], 0 }
   0x2   :  { %12 = vsyncpa [#allocation9], 0 }
   0x3   :  { %13 = vsyncpa [#allocation4], 0  ;;  %s882_s18 = smov [#allocation5]   ;;  %s883_s20 = smov [#allocation2]  }
   0x4   :  { %s31_s19 = sshll.u32 %s882_s18, 4  ;;  %s19_s21 = sshll.u32 %s883_s20, 4  ;;  %s32_s19 = int_to_ptr.vmem [resolvable:$true] %s31_s19  ;;  %s921_s21 = int_to_ptr.vmem [resolvable:$true] %s19_s21 }
   0x5   :  { %s764_s24 = scalar_lea.hbm %s1049_s1, 1024 }
   0x6   :  { %p765_p0 = scmp.ne.s32.totalorder %s1049_s1, %s764_s24  ;;  %p768_p1 = scmp.lt.u32.totalorder %s764_s24, %s1049_s1 }
   0x8   :  { %p770_p2 = pnand %p768_p1, %p765_p0 }
   0xa   :  { %773 = shalt.err (!%p770_p2)
}
   0xb   :  { %s774_s29 = scalar_lea.vmem %s32_s19, 1024  ;;  %p779_p4 = scmp.lt.s32.totalorder %s32_s19, %s32_s19 }
   0xc   :  { %p775_p3 = scmp.ne.s32.totalorder %s32_s19, %s774_s29  ;;  %p780_p5 = scmp.lt.s32.totalorder %s774_s29, %s774_s29 }
   0xe   :  { %p781_p6 = por %p780_p5, %p779_p4 }
  0x10   :  { %p782_p7 = pnand %p781_p6, %p775_p3 }
  0x12   :  { %785 = shalt.err (!%p782_p7)
}
  0x13   :  { %s884_s30 = smov 64   ;;  %s885_s6 = smov 4  }
  0x14   :  { %37 = dma.hbm_to_vmem [thread:$0]  %s1049_s1, 1024, %s32_s19, [#allocation6], %s884_s30, %s884_s30, %s885_s6  }
  0x15   :  { %s786_s11 = scalar_lea.hbm %s1048_s0, 1024 }
  0x16   :  { %p787_p8 = scmp.ne.s32.totalorder %s1048_s0, %s786_s11  ;;  %p790_p9 = scmp.lt.u32.totalorder %s786_s11, %s1048_s0 }
  0x18   :  { %p792_p10 = pnand %p790_p9, %p787_p8 }
  0x1a   :  { %795 = shalt.err (!%p792_p10)
}
  0x1b   :  { %s796_s16 = scalar_lea.vmem %s921_s21, 1024  ;;  %p801_p12 = scmp.lt.s32.totalorder %s921_s21, %s921_s21 }
  0x1c   :  { %p797_p11 = scmp.ne.s32.totalorder %s921_s21, %s796_s16  ;;  %p802_p13 = scmp.lt.s32.totalorder %s796_s16, %s796_s16 }
  0x1e   :  { %p803_p0 = por %p802_p13, %p801_p12 }
  0x20   :  { %p804_p1 = pnand %p803_p0, %p797_p11 }
  0x22   :  { %807 = shalt.err (!%p804_p1)
}
  0x23   :  { %25 = dma.hbm_to_vmem [thread:$0]  %s1048_s0, 1024, %s921_s21, [#allocation3], %s884_s30, %s884_s30, %s885_s6  }
  0x24   :  { %s886_s18 = smov [#allocation7]   ;;  %s887_s20 = smov [#allocation8]  }
  0x25   :  { %s43_s19 = sshll.u32 %s886_s18, 4  ;;  %s55_s22 = sshll.u32 %s887_s20, 4  ;;  %s44_s19 = int_to_ptr.vmem [resolvable:$true] %s43_s19  ;;  %s958_s22 = int_to_ptr.vmem [resolvable:$true] %s55_s22 }
  0x26   :  { %s808_s25 = scalar_lea.hbm %s1050_s2, 1024 }
  0x27   :  { %p809_p2 = scmp.ne.s32.totalorder %s1050_s2, %s808_s25  ;;  %p812_p3 = scmp.lt.u32.totalorder %s808_s25, %s1050_s2 }
  0x29   :  { %p814_p4 = pnand %p812_p3, %p809_p2 }
  0x2b   :  { %817 = shalt.err (!%p814_p4)
}
  0x2c   :  { %s818_s0 = scalar_lea.vmem %s44_s19, 1024  ;;  %p823_p6 = scmp.lt.s32.totalorder %s44_s19, %s44_s19 }
  0x2d   :  { %p819_p5 = scmp.ne.s32.totalorder %s44_s19, %s818_s0  ;;  %p824_p7 = scmp.lt.s32.totalorder %s818_s0, %s818_s0 }
  0x2f   :  { %p825_p8 = por %p824_p7, %p823_p6 }
  0x31   :  { %p826_p9 = pnand %p825_p8, %p819_p5 }
  0x33   :  { %829 = shalt.err (!%p826_p9)
}
  0x34   :  { %49 = dma.hbm_to_vmem [thread:$0]  %s1050_s2, 1024, %s44_s19, [#allocation6], %s884_s30, %s884_s30, %s885_s6  }
  0x35   :  { %s830_s10 = scalar_lea.hbm %s1051_s3, 1024 }
  0x36   :  { %p831_p10 = scmp.ne.s32.totalorder %s1051_s3, %s830_s10  ;;  %p834_p11 = scmp.lt.u32.totalorder %s830_s10, %s1051_s3 }
  0x38   :  { %p836_p12 = pnand %p834_p11, %p831_p10 }
  0x3a   :  { %839 = shalt.err (!%p836_p12)
}
  0x3b   :  { %s840_s15 = scalar_lea.vmem %s958_s22, 1024  ;;  %p845_p0 = scmp.lt.s32.totalorder %s958_s22, %s958_s22 }
  0x3c   :  { %p841_p13 = scmp.ne.s32.totalorder %s958_s22, %s840_s15  ;;  %p846_p1 = scmp.lt.s32.totalorder %s840_s15, %s840_s15 }
  0x3e   :  { %p847_p2 = por %p846_p1, %p845_p0 }
  0x40   :  { %p848_p3 = pnand %p847_p2, %p841_p13 }
  0x42   :  { %851 = shalt.err (!%p848_p3)
}
  0x43   :  { %61 = dma.hbm_to_vmem [thread:$0]  %s1051_s3, 1024, %s958_s22, [#allocation9], %s884_s30, %s884_s30, %s885_s6  }
  0x44   :  { %874 = dma.done.wait [#allocation3], 1024  }
  0x45   :  { %875 = vsyncadd [#allocation3], 4294966272 }
  0x46   :  { %876 = dma.done.wait [#allocation6], 2048  }
  0x47   :  { %877 = vsyncadd [#allocation6], 4294965248 }
  0x48   :  { %878 = dma.done.wait [#allocation9], 1024  }
  0x49   :  { %879 = vsyncadd [#allocation9], 4294966272  ;;  %v888_v0 = vmov 0.0   ;;  %vm889_vm0 = vmmov 0   ;;  %v736_v1 = vld [vmem:[#allocation5] sm:$0xff]   ;;  %v737_v2 = vld [vmem:[#allocation5 + $0x8] sm:$0xff]  }
  0x4a   :  { %667 = vmatprep.subr.bf16.mxu0 %v888_v0  ;;  %683 = vmatprep.mubr.msk.bf16.mxu0 %vm889_vm0, %v888_v0  ;;  %v738_v3 = vld [vmem:[#allocation5 + $0x10] sm:$0xff]   ;;  %v739_v4 = vld [vmem:[#allocation5 + $0x18] sm:$0xff]   ;;  %v602_v5 = vld [vmem:[#allocation2] sm:$0xff]   ;;  %vm223_vm1 = vcmask 1041409   ;;  %vm225_vm2 = vcmask 1042434   ;;  %vm227_vm3 = vcmask 1043459  }
  0x4b   :  { %687 = vmatprep.subr.bf16.mxu1 %v888_v0  ;;  %703 = vmatprep.mubr.msk.bf16.mxu1 %vm889_vm0, %v888_v0  ;;  %v633_v6 = vld [vmem:[#allocation2 + $0x8] sm:$0xff]   ;;  %v634_v7 = vld [vmem:[#allocation2 + $0x10] sm:$0xff]   ;;  %v603_v8 = vunpack.c.l.bf16 %v602_v5  ;;  %v604_v9 = vunpack.c.h.bf16 %v602_v5  ;;  %v635_v12 = vld [vmem:[#allocation2 + $0x18] sm:$0xff]   ;;  %vm229_vm4 = vcmask 1044484   ;;  %vm231_vm5 = vcmask 1045509   ;;  %s890_s19 = smov [#allocation10]  }
  0x4c   :  { %668 = vmatpush3.bf16.msra.mxu0 %v736_v1  ;;  %v607_v10 = vunpack.c.l.bf16 %v633_v6  ;;  %v608_v11 = vunpack.c.h.bf16 %v633_v6  ;;  %v636_v13 = vld [vmem:[#allocation2 + $0x20] sm:$0xff]   ;;  %v637_v14 = vld [vmem:[#allocation2 + $0x28] sm:$0xff]   ;;  %v611_v15 = vunpack.c.l.bf16 %v634_v7  ;;  %v612_v16 = vunpack.c.h.bf16 %v634_v7  ;;  %v638_v19 = vld [vmem:[#allocation2 + $0x30] sm:$0xff]   ;;  %s563_s20 = sshll.u32 %s890_s19, 4  ;;  %s564_s20 = int_to_ptr.vmem [resolvable:$true] %s563_s20 }
  0x4d   :  { %669 = vmatprep.subr.bf16.mxu0 %v888_v0  ;;  %v615_v17 = vunpack.c.l.bf16 %v635_v12  ;;  %v616_v18 = vunpack.c.h.bf16 %v635_v12  ;;  %v639_v20 = vld [vmem:[#allocation2 + $0x38] sm:$0xff]   ;;  %v619_v21 = vunpack.c.l.bf16 %v636_v13  ;;  %v620_v22 = vunpack.c.h.bf16 %v636_v13  ;;  %v744_v25 = vld [vmem:[#allocation7] sm:$0xff]   ;;  %v745_v34 = vld [vmem:[#allocation7 + $0x8] sm:$0xff]   ;;  %s852_s22 = scalar_lea.vmem %s564_s20, 128  ;;  %p857_p5 = scmp.lt.s32.totalorder %s564_s20, %s564_s20 }
  0x4e   :  { %v623_v23 = vunpack.c.l.bf16 %v637_v14  ;;  %v624_v24 = vunpack.c.h.bf16 %v637_v14  ;;  %v627_v26 = vunpack.c.l.bf16 %v638_v19  ;;  %v628_v27 = vunpack.c.h.bf16 %v638_v19  ;;  %688 = vmatpush3.bf16.msra.mxu1 %v744_v25  ;;  %v740_v35 = vld [vmem:[#allocation5 + $0x20] sm:$0xff]   ;;  %v746_v48 = vld [vmem:[#allocation7 + $0x10] sm:$0xff]   ;;  %v741_v53 = vld [vmem:[#allocation5 + $0x28] sm:$0xff]   ;;  %p853_p4 = scmp.ne.s32.totalorder %s564_s20, %s852_s22  ;;  %p858_p6 = scmp.lt.s32.totalorder %s852_s22, %s852_s22 }
  0x4f   :  { %v631_v28 = vunpack.c.l.bf16 %v639_v20  ;;  %v632_v29 = vunpack.c.h.bf16 %v639_v20  ;;  %v112_v30 = vadd.f32 %v604_v9, %v603_v8  ;;  %v119_v31 = vadd.f32 %v608_v11, %v607_v10  ;;  %689 = vmatprep.subr.bf16.mxu1 %v888_v0  ;;  %v747_v62 = vld [vmem:[#allocation7 + $0x18] sm:$0xff]   ;;  %v742_v63 = vld [vmem:[#allocation5 + $0x30] sm:$0xff]  }
  0x50   :  { %670 = vmatpush3.bf16.msra.mxu0 %v737_v2  ;;  %v126_v32 = vadd.f32 %v612_v16, %v611_v15  ;;  %v133_v33 = vadd.f32 %v616_v18, %v615_v17  ;;  %v140_v36 = vadd.f32 %v620_v22, %v619_v21  ;;  %v147_v37 = vadd.f32 %v624_v24, %v623_v23  ;;  %v748_v17 = vld [vmem:[#allocation7 + $0x20] sm:$0xff]   ;;  %v743_v18 = vld [vmem:[#allocation5 + $0x38] sm:$0xff]   ;;  %p859_p7 = por %p858_p6, %p857_p5 }
  0x51   :  { %671 = vmatprep.subr.bf16.mxu0 %v888_v0  ;;  %v154_v38 = vadd.f32 %v628_v27, %v627_v26  ;;  %v161_v39 = vadd.f32 %v632_v29, %v631_v28  ;;  %v113_v40 = vrot.slane %v112_v30, 4  ;;  %v120_v41 = vrot.slane %v119_v31, 4 }
  0x52   :  { %v127_v42 = vrot.slane %v126_v32, 4  ;;  %v134_v43 = vrot.slane %v133_v33, 4  ;;  %v141_v44 = vrot.slane %v140_v36, 4  ;;  %v148_v45 = vrot.slane %v147_v37, 4  ;;  %690 = vmatpush3.bf16.msra.mxu1 %v745_v34  ;;  %p860_p8 = pnand %p859_p7, %p853_p4 }
  0x53   :  { %v155_v46 = vrot.slane %v154_v38, 4  ;;  %v162_v47 = vrot.slane %v161_v39, 4  ;;  %v114_v49 = vadd.f32 %v113_v40, %v112_v30  ;;  %v121_v50 = vadd.f32 %v120_v41, %v119_v31  ;;  %691 = vmatprep.subr.bf16.mxu1 %v888_v0 }
  0x54   :  { %672 = vmatpush3.bf16.msra.mxu0 %v738_v3  ;;  %v128_v51 = vadd.f32 %v127_v42, %v126_v32  ;;  %v135_v52 = vadd.f32 %v134_v43, %v133_v33  ;;  %v142_v54 = vadd.f32 %v141_v44, %v140_v36  ;;  %v149_v55 = vadd.f32 %v148_v45, %v147_v37  ;;  %v749_v43 = vld [vmem:[#allocation7 + $0x28] sm:$0xff]  }
  0x55   :  { %673 = vmatprep.subr.bf16.mxu0 %v888_v0  ;;  %v156_v56 = vadd.f32 %v155_v46, %v154_v38  ;;  %v163_v57 = vadd.f32 %v162_v47, %v161_v39  ;;  %v115_v58 = vrot.slane %v114_v49, 2  ;;  %v122_v59 = vrot.slane %v121_v50, 2 }
  0x56   :  { %v129_v60 = vrot.slane %v128_v51, 2  ;;  %v136_v61 = vrot.slane %v135_v52, 2  ;;  %v143_v1 = vrot.slane %v142_v54, 2  ;;  %v150_v2 = vrot.slane %v149_v55, 2  ;;  %692 = vmatpush3.bf16.msra.mxu1 %v746_v48 }
  0x57   :  { %v157_v3 = vrot.slane %v156_v56, 2  ;;  %v116_v5 = vadd.f32 %v115_v58, %v114_v49  ;;  %v123_v6 = vadd.f32 %v122_v59, %v121_v50  ;;  %693 = vmatprep.subr.bf16.mxu1 %v888_v0  ;;  %vm233_vm6 = vcmask 1046534  }
  0x58   :  { %674 = vmatpush3.bf16.msra.mxu0 %v739_v4  ;;  %v164_v4 = vrot.slane %v163_v57, 2  ;;  %v130_v7 = vadd.f32 %v129_v60, %v128_v51  ;;  %v137_v8 = vadd.f32 %v136_v61, %v135_v52  ;;  %v144_v9 = vadd.f32 %v143_v1, %v142_v54 }
  0x59   :  { %675 = vmatprep.subr.bf16.mxu0 %v888_v0  ;;  %v151_v10 = vadd.f32 %v150_v2, %v149_v55  ;;  %v158_v11 = vadd.f32 %v157_v3, %v156_v56  ;;  %v117_v13 = vrot.slane %v116_v5, 1  ;;  %v124_v14 = vrot.slane %v123_v6, 1  ;;  %v750_v55 = vld [vmem:[#allocation7 + $0x30] sm:$0xff]   ;;  %v751_v2 = vld [vmem:[#allocation7 + $0x38] sm:$0xff]   ;;  %v752_v3 = vld [vmem:[#allocation8] sm:$0xff]  }
  0x5a   :  { %v165_v12 = vadd.f32 %v164_v4, %v163_v57  ;;  %v131_v15 = vrot.slane %v130_v7, 1  ;;  %v138_v16 = vrot.slane %v137_v8, 1  ;;  %v145_v19 = vrot.slane %v144_v9, 1  ;;  %694 = vmatpush3.bf16.msra.mxu1 %v747_v62  ;;  %v753_v4 = vld [vmem:[#allocation8 + $0x8] sm:$0xff]  }
  0x5b   :  { %v152_v20 = vrot.slane %v151_v10, 1  ;;  %v159_v21 = vrot.slane %v158_v11, 1  ;;  %v118_v23 = vadd.f32 %v117_v13, %v116_v5  ;;  %v125_v24 = vadd.f32 %v124_v14, %v123_v6  ;;  %695 = vmatprep.subr.bf16.mxu1 %v888_v0  ;;  %v754_v5 = vld [vmem:[#allocation8 + $0x10] sm:$0xff]   ;;  %v755_v6 = vld [vmem:[#allocation8 + $0x18] sm:$0xff]   ;;  %v756_v14 = vld [vmem:[#allocation8 + $0x20] sm:$0xff]  }
  0x5c   :  { %676 = vmatpush3.bf16.msra.mxu0 %v740_v35  ;;  %v166_v22 = vrot.slane %v165_v12, 1  ;;  %v132_v25 = vadd.f32 %v131_v15, %v130_v7  ;;  %v139_v26 = vadd.f32 %v138_v16, %v137_v8  ;;  %v146_v27 = vadd.f32 %v145_v19, %v144_v9  ;;  %v574_v7 = vld [vmem:[%s1052_s4] ss:$0 sm:$0xff]  ;;  %v757_v15 = vld [vmem:[#allocation8 + $0x28] sm:$0xff]   ;;  %v758_v16 = vld [vmem:[#allocation8 + $0x30] sm:$0xff]  }
  0x5d   :  { %677 = vmatprep.subr.bf16.mxu0 %v888_v0  ;;  %v153_v28 = vadd.f32 %v152_v20, %v151_v10  ;;  %v160_v29 = vadd.f32 %v159_v21, %v158_v11  ;;  %v169_v31 = vmul.f32 0.0625, %v118_v23  ;;  %v170_v32 = vmul.f32 0.0625, %v125_v24 }
  0x5e   :  { %v167_v30 = vadd.f32 %v166_v22, %v165_v12  ;;  %v171_v33 = vmul.f32 0.0625, %v132_v25  ;;  %v172_v34 = vmul.f32 0.0625, %v139_v26  ;;  %v173_v35 = vmul.f32 0.0625, %v146_v27  ;;  %696 = vmatpush3.bf16.msra.mxu1 %v748_v17  ;;  %v759_v17 = vld [vmem:[#allocation8 + $0x38] sm:$0xff]   ;;  %v592_v26 = vld [vmem:[%s1052_s4 + $0x2] ss:$0 sm:$0xff] }
  0x5f   :  { %v174_v36 = vmul.f32 0.0625, %v153_v28  ;;  %v175_v37 = vmul.f32 0.0625, %v160_v29  ;;  %v177_v39 = vpack.c.bf16 %v169_v31, %v169_v31  ;;  %v178_v40 = vpack.c.bf16 %v170_v32, %v170_v32  ;;  %697 = vmatprep.subr.bf16.mxu1 %v888_v0 }
  0x60   :  { %678 = vmatpush3.bf16.msra.mxu0 %v741_v53  ;;  %v176_v38 = vmul.f32 0.0625, %v167_v30  ;;  %v179_v41 = vpack.c.bf16 %v171_v33, %v171_v33  ;;  %v180_v42 = vpack.c.bf16 %v172_v34, %v172_v34  ;;  %v181_v44 = vpack.c.bf16 %v173_v35, %v173_v35 }
  0x61   :  { %679 = vmatprep.subr.bf16.mxu0 %v888_v0  ;;  %v182_v45 = vpack.c.bf16 %v174_v36, %v174_v36  ;;  %v183_v46 = vpack.c.bf16 %v175_v37, %v175_v37  ;;  %v215_v48 = vunpack.c.l.b16 %v177_v39  ;;  %v216_v49 = vunpack.c.l.b16 %v178_v40 }
  0x62   :  { %v184_v47 = vpack.c.bf16 %v176_v38, %v176_v38  ;;  %v217_v50 = vunpack.c.l.b16 %v179_v41  ;;  %v218_v51 = vunpack.c.l.b16 %v180_v42  ;;  %v219_v52 = vunpack.c.l.b16 %v181_v44  ;;  %698 = vmatpush3.bf16.msra.mxu1 %v749_v43 }
  0x63   :  { %v220_v53 = vunpack.c.l.b16 %v182_v45  ;;  %v224_v54 = vsel %vm223_vm1, %v216_v49, %v215_v48  ;;  %v221_v56 = vunpack.c.l.b16 %v183_v46  ;;  %699 = vmatprep.subr.bf16.mxu1 %v888_v0  ;;  %vm235_vm7 = vcmask 1047559  }
  0x64   :  { %680 = vmatpush3.bf16.msra.mxu0 %v742_v63  ;;  %v226_v57 = vsel %vm225_vm2, %v217_v50, %v224_v54  ;;  %v222_v58 = vunpack.c.l.b16 %v184_v47 }
  0x65   :  { %681 = vmatprep.subr.bf16.mxu0 %v888_v0  ;;  %v228_v59 = vsel %vm227_vm3, %v218_v51, %v226_v57 }
  0x66   :  { %v230_v60 = vsel %vm229_vm4, %v219_v52, %v228_v59  ;;  %700 = vmatpush3.bf16.msra.mxu1 %v750_v55 }
  0x67   :  { %v232_v61 = vsel %vm231_vm5, %v220_v53, %v230_v60  ;;  %701 = vmatprep.subr.bf16.mxu1 %v888_v0 }
  0x68   :  { %682 = vmatpush3.bf16.msra.mxu0 %v743_v18  ;;  %v234_v62 = vsel %vm233_vm6, %v221_v56, %v232_v61  ;;  %v583_v18 = vld [vmem:[%s1052_s4 + $0x1] ss:$0 sm:$0xff] }
  0x69   :  { %707 = vmatprep.subr.bf16.mxu0 %v888_v0  ;;  %v236_v63 = vsel %vm235_vm7, %v222_v58, %v234_v62 }
  0x6a   :  { %v237_v1 = vpack.c.b16 %v236_v63, %v236_v63  ;;  %702 = vmatpush3.bf16.msra.mxu1 %v751_v2 }
  0x6c   :  { %684 = vmatmul.mubr.bf16.vlgmr.msra.gmra.mrb[0].mxu0 %v237_v1 }
  0x6d   :  { %723 = vmatprep.mubr.msk.bf16.mxu0 %vm889_vm0, %v888_v0  ;;  %708 = vmatpush3.bf16.msra.mxu0 %v752_v3 }
  0x6e   :  { %709 = vmatprep.subr.bf16.mxu0 %v888_v0 }
  0x71   :  { %710 = vmatpush3.bf16.msra.mxu0 %v753_v4 }
  0x72   :  { %711 = vmatprep.subr.bf16.mxu0 %v888_v0 }
  0x75   :  { %712 = vmatpush3.bf16.msra.mxu0 %v754_v5 }
  0x76   :  { %713 = vmatprep.subr.bf16.mxu0 %v888_v0 }
  0x79   :  { %714 = vmatpush3.bf16.msra.mxu0 %v755_v6 }
  0x7a   :  { %715 = vmatprep.subr.bf16.mxu0 %v888_v0 }
  0x7d   :  { %716 = vmatpush3.bf16.msra.mxu0 %v756_v14 }
  0x7e   :  { %717 = vmatprep.subr.bf16.mxu0 %v888_v0 }
  0x81   :  { %718 = vmatpush3.bf16.msra.mxu0 %v757_v15 }
  0x82   :  { %719 = vmatprep.subr.bf16.mxu0 %v888_v0 }
  0x85   :  { %720 = vmatpush3.bf16.msra.mxu0 %v758_v16 }
  0x86   :  { %721 = vmatprep.subr.bf16.mxu0 %v888_v0 }
  0x89   :  { %722 = vmatpush3.bf16.msra.mxu0 %v759_v17 }
 0x13f   :  { %v321_v8 = vpop.f32.mrb[0].mxu0 }
 0x140   :  { %v322_v9 = vadd.f32 %v574_v7, %v321_v8  ;;  %v685_v10 = vpop.f32.mrb[1].mxu0 }
 0x141   :  { %v324_v11 = vpop.f32.mrb[2].mxu0 }
 0x142   :  { %v327_v12 = vpack.c.bf16 %v322_v9, %v322_v9  ;;  %v686_v13 = vpop.f32.mrb[3].mxu0 }
 0x144   :  { %704 = vmatmul.mubr.bf16.vlgmr.msra.gmra.mrb[0].mxu1 %v327_v12 }
 0x217   :  { %v432_v19 = vpop.f32.mrb[0].mxu1 }
 0x218   :  { %v433_v20 = vadd.f32 %v583_v18, %v432_v19  ;;  %v705_v21 = vpop.f32.mrb[1].mxu1 }
 0x219   :  { %v435_v22 = vpop.f32.mrb[2].mxu1 }
 0x21a   :  { %760 = vtanh.f32 %v433_v20  ;;  %v706_v23 = vpop.f32.mrb[3].mxu1 }
 0x224   :  { %v761_v24 = vpop.eup %760 }
 0x225   :  { %v439_v25 = vpack.c.bf16 %v761_v24, %v761_v24 }
 0x227   :  { %724 = vmatmul.mubr.bf16.vlgmr.msra.gmra.mrb[4].mxu0 %v439_v25 }
 0x2fa   :  { %v544_v0 = vpop.f32.mrb[4].mxu0 }
 0x2fb   :  { %v545_v27 = vadd.f32 %v592_v26, %v544_v0  ;;  %v725_v28 = vpop.f32.mrb[5].mxu0 }
 0x2fc   :  { %v547_v29 = vpop.f32.mrb[6].mxu0 }
 0x2fd   :  { %v726_v30 = vpop.f32.mrb[7].mxu0  ;;  %v550_v31 = vmul.f32 %v545_v27, %v545_v27 }
 0x2ff   :  { %551 = vadd.xlane.f32.xlu0 %v550_v31 }
 0x38c   :  { %v552_v32 = vpop.xlane.xlu0 %551 }
 0x38d   :  { %v553_v33 = vmax.f32 %v552_v32, 1e-24 }
 0x38f   :  { %762 = vrsqrt.f32 %v553_v33 }
 0x399   :  { %v763_v34 = vpop.eup %762 }
 0x39a   :  { %v555_v35 = vmul.f32 %v763_v34, %v545_v27 }
 0x39c   :  { %556 = vst [vmem:[#allocation10] sm:$0xff] %v555_v35 }
 0x39d   :  { %863 = shalt.err (!%p860_p8)
}
 0x39e   :  { %s864_s24 = scalar_lea.hbm %s1053_s5, 128 }
 0x39f   :  { %p865_p9 = scmp.ne.s32.totalorder %s1053_s5, %s864_s24  ;;  %p868_p10 = scmp.lt.u32.totalorder %s864_s24, %s1053_s5 }
 0x3a1   :  { %p870_p11 = pnand %p868_p10, %p865_p9 }
 0x3a3   :  { %873 = shalt.err (!%p870_p11)
}
 0x3a4   :  { %566 = dma.vmem_to_hbm [thread:$0]  %s564_s20, 128, %s1053_s5, [#allocation4]  }
 0x3a5   :  { %880 = dma.done.wait [#allocation4], 128  }
 0x3a6   :  { %881 = vsyncadd [#allocation4], 4294967168 }
 0x3a7   :  { %570 = vsyncpa [#allocation3], 1 }
 0x3a8   :  { %571 = vsyncpa [#allocation6], 1 }
 0x3a9   :  { %572 = vsyncpa [#allocation9], 1 }
 0x3aa   :  { %573 = vsyncpa [#allocation4], 1 }

</bundles_post_ra>
